<compile_context>
chip_gen: v6e
topology: v6e:2x2x1
jax: 0.10.0
libtpu: 0.0.40
codegen_flags: <defaults>
</compile_context>

<pallas_src>
import jax
import jax.numpy as jnp
from jax.experimental import pallas as pl
from jax.experimental.pallas import tpu as pltpu


# --------------------------------------------------------------------------------------
# Fused CAM kernel: one grid step per block of `block_b` batch elements.
# --------------------------------------------------------------------------------------
def _make_cam_kernel(value_matmul_dtype):
    def kernel(gamma_ref, x_ref, fb_ref, o_ref):
        # gamma_ref: (1,) f32 in SMEM (scalar prefetch).
        # x_ref, fb_ref, o_ref: (block_b, C, N) VMEM tiles at the inputs' native dtype.
        fb = fb_ref[...]

        # energy[b, c, d] = sum_n fb[b, c, n] * fb[b, d, n]    (contraction over N)
        # Kept at the input dtype (f32 in the demo) -- this is the rounding-sensitive
        # step since it feeds exp(); cast to bf16 here only if the accuracy budget
        # at production shapes allows it.
        energy = jnp.einsum(
            "bcn,bdn->bcd", fb, fb, preferred_element_type=jnp.float32
        )  # (block_b, C, C) f32

        # softmax(rowmax(E) - E) == softmax(-E); numerically-stable form uses a single
        # row reduction: p = exp(rowmin(E) - E).
        row_min = jnp.min(energy, axis=-1, keepdims=True)
        p = jnp.exp(row_min - energy)
        denom = jnp.sum(p, axis=-1, keepdims=True)
        # One reciprocal per row on the EUP (free slot), then a broadcast multiply.
        attn = p * pl.reciprocal(denom, approx=True)

        # out[b, c, n] = sum_d attn[b, c, d] * fb[b, d, n]   (bf16 MXU, f32 accumulate)
        out = jnp.einsum(
            "bcd,bdn->bcn",
            attn.astype(value_matmul_dtype),
            fb.astype(value_matmul_dtype),
            preferred_element_type=jnp.float32,
        )  # (block_b, C, N) f32

        # Fused epilogue: learnable scale + residual, stored lane-dense (N mult. of 128).
        res = x_ref[...].astype(jnp.float32) + gamma_ref[0] * out
        o_ref[...] = res.astype(o_ref.dtype)

    return kernel


# --------------------------------------------------------------------------------------
# Wrapper
# --------------------------------------------------------------------------------------
def cam_module(x, fb, gamma, *, block_b=None, value_matmul_dtype=jnp.bfloat16):
    """CAM_Module forward.  x, fb: (B, C, H, W); gamma: scalar.  Returns (B, C, H, W)."""
    B, C, H, W = x.shape
    N = H * W

    # Contiguous reshapes only -- no dtype copies, no transposes.
    x_flat = x.reshape(B, C, N)
    fb_flat = fb.reshape(B, C, N)
    gamma_arr = jnp.asarray(gamma, jnp.float32).reshape(1)

    # Block several images per grid step to amortize per-step overhead (largest
    # divisor of B up to 8).
    if block_b is None:
        block_b = max(d for d in range(1, min(B, 8) + 1) if B % d == 0)
    assert B % block_b == 0

    # index_maps receive the scalar-prefetch ref as a trailing positional arg.
    def tile_spec():
        return pl.BlockSpec((block_b, C, N), lambda i, gamma_ref: (i, 0, 0))

    # Raise the scoped-VMEM limit only when the double-buffered working set is large
    # (x, fb, out tiles, 2 buffers each).  At the demo shape this stays None.
    tile_bytes = block_b * C * N * x.dtype.itemsize
    working_set = 3 * 2 * tile_bytes
    vmem_limit = int(min(2 * working_set, 100 << 20)) if working_set > (24 << 20) else None
    # TODO(synk): at production CAM shapes (C~512, N~4096) restructure to N-tiling with a
    # (C, C) VMEM energy scratch (accumulate energy over N chunks, softmax once, stream
    # out per chunk) so v7x's 64 MiB VMEM is not exceeded.

    out_flat = pl.pallas_call(
        _make_cam_kernel(value_matmul_dtype),
        grid_spec=pltpu.PrefetchScalarGridSpec(
            num_scalar_prefetch=1,               # gamma -> SMEM
            grid=(B // block_b,),
            in_specs=[tile_spec(), tile_spec()],  # x_flat, fb_flat
            out_specs=tile_spec(),
        ),
        out_shape=jax.ShapeDtypeStruct((B, C, N), x.dtype),
        # x_flat is call-arg index 1 (after the scalar-prefetch gamma); the residual
        # output has identical shape/dtype, so reuse its buffer.
        input_output_aliases={1: 0},
        compiler_params=pltpu.CompilerParams(
            dimension_semantics=("parallel",),   # megacore: one batch block per core
            vmem_limit_bytes=vmem_limit,
        ),
    )(gamma_arr, x_flat, fb_flat)

    return out_flat.reshape(B, C, H, W)


# --------------------------------------------------------------------------------------
# Demo / self-check
# --------------------------------------------------------------------------------------
if __name__ == "__main__":
    B, C, H, W = 2, 32, 16, 16

    key = jax.random.PRNGKey(0)
    kx, kfb = jax.random.split(key)
    x = jax.random.normal(kx, (B, C, H, W), jnp.float32)
    fb = jax.random.normal(kfb, (B, C, H, W), jnp.float32)

    # PyTorch initializes gamma to 0 (output would simply equal x); use a deterministic
    # non-zero value so the attention path is actually exercised.
    gamma = jnp.float32(0.5)

    fwd = jax.jit(cam_module)
    out = jax.block_until_ready(fwd(x, fb, gamma))

    # Pure-JAX f32 reference of the same math (exact softmax / division).
    def ref(x, fb, gamma):
        Bb, Cc, Hh, Ww = x.shape
        fbf = fb.reshape(Bb, Cc, Hh * Ww).astype(jnp.float32)
        energy = jnp.einsum("bcn,bdn->bcd", fbf, fbf)
        e_new = jnp.max(energy, axis=-1, keepdims=True) - energy
        attn = jax.nn.softmax(e_new, axis=-1)
        o = jnp.einsum("bcd,bdn->bcn", attn, fbf).reshape(x.shape)
        return x + gamma * o

    expect = ref(x, fb, gamma)
    assert out.shape == (B, C, H, W)
    assert bool(jnp.all(jnp.isfinite(out)))
    max_err = float(jnp.max(jnp.abs(out - expect)))
    # Tolerance covers bf16 operands in the value matmul + the approx EUP reciprocal.
    assert bool(jnp.allclose(out, expect, atol=2e-2, rtol=2e-2)), max_err
    print("KERNEL_OK")
</pallas_src>

<mosaic_0001>
module attributes {stable_mosaic.version = 11 : i64} {
  func.func @kernel(%arg0: i32, %arg1: memref<1xf32, #tpu.memory_space<smem>>, %arg2: memref<2x32x256xf32, #tpu.memory_space<vmem>>, %arg3: memref<2x32x256xf32, #tpu.memory_space<vmem>>, %arg4: memref<2x32x256xf32, #tpu.memory_space<vmem>>) attributes {dimension_semantics = [#tpu.dimension_semantics<parallel>], iteration_bounds = array<i64: 1>, scalar_prefetch = 1 : i64, scratch_operands = 0 : i64, tpu.core_type = #tpu.core_type<tc>, window_params = [{transform_indices = @transform_0, window_bounds = array<i64: 2, 32, 256>}, {transform_indices = @transform_1, window_bounds = array<i64: 2, 32, 256>}, {transform_indices = @transform_2, window_bounds = array<i64: 2, 32, 256>}]} {
    %c0 = arith.constant 0 : index
    %c0_0 = arith.constant 0 : index
    %c0_1 = arith.constant 0 : index
    %0 = vector.load %arg3[%c0, %c0_0, %c0_1] : memref<2x32x256xf32, #tpu.memory_space<vmem>>, vector<2x32x256xf32>
    "tpu.trace_start"() <{level = 10 : i32, message = "bcn,bdn->bcd"}> : () -> ()
    %cst = arith.constant dense<0.000000e+00> : vector<2x32x32xf32>
    %1 = tpu.matmul %0, %0, %cst {dimension_numbers = #tpu.dot_dimension_numbers<[2], [2], [1], [1], [0, 0, 0, 1, 1, 1], [0], [0]>} : vector<2x32x256xf32>, vector<2x32x256xf32>, vector<2x32x32xf32> -> vector<2x32x32xf32>
    "tpu.trace_stop"() : () -> ()
    %cst_2 = arith.constant dense<0x7F800000> : vector<2x32xf32>
    %2 = vector.multi_reduction <minimumf>, %1, %cst_2 [2] : vector<2x32x32xf32> to vector<2x32xf32>
    %3 = vector.shape_cast %2 : vector<2x32xf32> to vector<2x32x1xf32>
    %4 = vector.broadcast %3 : vector<2x32x1xf32> to vector<2x32x32xf32>
    %5 = arith.subf %4, %1 : vector<2x32x32xf32>
    %6 = math.exp %5 : vector<2x32x32xf32>
    %cst_3 = arith.constant dense<0.000000e+00> : vector<2x32xf32>
    %7 = vector.multi_reduction <add>, %6, %cst_3 [2] : vector<2x32x32xf32> to vector<2x32xf32>
    %8 = vector.shape_cast %7 : vector<2x32xf32> to vector<2x32x1xf32>
    %9 = tpu.reciprocal %8 {approx = true} : vector<2x32x1xf32> -> vector<2x32x1xf32>
    %10 = vector.broadcast %9 : vector<2x32x1xf32> to vector<2x32x32xf32>
    %11 = arith.mulf %6, %10 : vector<2x32x32xf32>
    %12 = arith.truncf %11 : vector<2x32x32xf32> to vector<2x32x32xbf16>
    %13 = arith.truncf %0 : vector<2x32x256xf32> to vector<2x32x256xbf16>
    "tpu.trace_start"() <{level = 10 : i32, message = "bcd,bdn->bcn"}> : () -> ()
    %cst_4 = arith.constant dense<0.000000e+00> : vector<2x32x256xf32>
    %14 = tpu.matmul %12, %13, %cst_4 {dimension_numbers = #tpu.dot_dimension_numbers<[2], [1], [1], [2], [0, 0, 0, 1, 1, 2], [0], [0]>} : vector<2x32x32xbf16>, vector<2x32x256xbf16>, vector<2x32x256xf32> -> vector<2x32x256xf32>
    "tpu.trace_stop"() : () -> ()
    %c0_5 = arith.constant 0 : index
    %c0_6 = arith.constant 0 : index
    %c0_7 = arith.constant 0 : index
    %15 = vector.load %arg2[%c0_5, %c0_6, %c0_7] : memref<2x32x256xf32, #tpu.memory_space<vmem>>, vector<2x32x256xf32>
    %c0_8 = arith.constant 0 : index
    %16 = memref.load %arg1[%c0_8] : memref<1xf32, #tpu.memory_space<smem>>
    %17 = vector.broadcast %16 : f32 to vector<2x32x256xf32>
    %18 = arith.mulf %17, %14 : vector<2x32x256xf32>
    %19 = arith.addf %15, %18 : vector<2x32x256xf32>
    %c0_9 = arith.constant 0 : index
    %c0_10 = arith.constant 0 : index
    %c0_11 = arith.constant 0 : index
    %20 = vector.load %arg4[%c0_9, %c0_10, %c0_11] : memref<2x32x256xf32, #tpu.memory_space<vmem>>, vector<2x32x256xf32>
    tpu.vector_store %arg4[%c0_9, %c0_10, %c0_11], %19 {strides = array<i32>} : memref<2x32x256xf32, #tpu.memory_space<vmem>>, vector<2x32x256xf32>,
    return
  }
  func.func @transform_0(%arg0: i32, %arg1: memref<1xf32, #tpu.memory_space<smem>>) -> (i32, i32, i32) {
    %c0_i32 = arith.constant 0 : i32
    %c0_i32_0 = arith.constant 0 : i32
    %c0_i32_1 = arith.constant 0 : i32
    return %arg0, %c0_i32, %c0_i32_0 : i32, i32, i32
  }
  func.func @transform_1(%arg0: i32, %arg1: memref<1xf32, #tpu.memory_space<smem>>) -> (i32, i32, i32) {
    %c0_i32 = arith.constant 0 : i32
    %c0_i32_0 = arith.constant 0 : i32
    %c0_i32_1 = arith.constant 0 : i32
    return %arg0, %c0_i32, %c0_i32_0 : i32, i32, i32
  }
  func.func @transform_2(%arg0: i32, %arg1: memref<1xf32, #tpu.memory_space<smem>>) -> (i32, i32, i32) {
    %c0_i32 = arith.constant 0 : i32
    %c0_i32_0 = arith.constant 0 : i32
    %c0_i32_1 = arith.constant 0 : i32
    return %arg0, %c0_i32, %c0_i32_0 : i32, i32, i32
  }
}

</mosaic_0001>

<bundles_post_ra>
// kernel: cam_module.1
= control target key start
LH: loop header
LB: loop body
LE: loop exit
PB: predicated region body
PF: predicated region fallthrough
CT: control target
= control target key end

     0   :  { %vm200_vm0 = vcmask 261120   ;;  %s824_s2 = inlined_call_operand.vmem [shape: f32[2,32,256], index: 2, kind: input, shape index: {}]   ;;  %s825_s0 = inlined_call_operand.<no memory space> [shape: f32[1], index: 0, kind: input, shape index: {}]   ;;  %s826_s1 = inlined_call_operand.vmem [shape: f32[2,32,256], index: 1, kind: input, shape index: {}, may-alias: {1,3}]   ;;  %s827_s3 = inlined_call_operand.vmem [shape: f32[2,32,256], index: 3, kind: output, shape index: {}, may-alias: {1,3}]  }
   0x1   :  { %v550_v0 = vld [vmem:[%s824_s2 + $0x38] sm:$0xff]  ;;  %v560_v2 = vld [vmem:[%s824_s2 + $0x30] sm:$0xff]  ;;  %v572_v4 = vld [vmem:[%s824_s2 + $0x28] sm:$0xff] }
   0x2   :  { %v555_v1 = vld [vmem:[%s824_s2 + $0x78] sm:$0xff]  ;;  %54 = vmatprep.subr.mxu0 %v550_v0  ;;  %v567_v3 = vld [vmem:[%s824_s2 + $0x70] sm:$0xff]  ;;  %v577_v5 = vld [vmem:[%s824_s2 + $0x68] sm:$0xff] }
   0x3   :  { %139 = vmatprep.subr.mxu1 %v555_v1  ;;  %55 = vmatpush1.xpose.msra.mxu0 %v560_v2  ;;  %v584_v6 = vld [vmem:[%s824_s2 + $0x20] sm:$0xff]  ;;  %v600_v10 = vld [vmem:[%s824_s2 + $0x18] sm:$0xff]  ;;  %v610_v12 = vld [vmem:[%s824_s2 + $0x10] sm:$0xff] }
   0x4   :  { %140 = vmatpush1.xpose.msra.mxu1 %v567_v3  ;;  %v589_v7 = vld [vmem:[%s824_s2 + $0x60] sm:$0xff]  ;;  %56 = vmatprep.subr.mxu0 %v572_v4  ;;  %v295_v8 = vpack.c.bf16 %v560_v2, %v584_v6  ;;  %v605_v11 = vld [vmem:[%s824_s2 + $0x58] sm:$0xff]  ;;  %v615_v13 = vld [vmem:[%s824_s2 + $0x8] sm:$0xff] }
   0x5   :  { %141 = vmatprep.subr.mxu1 %v577_v5  ;;  %v299_v9 = vpack.c.bf16 %v567_v3, %v589_v7  ;;  %v620_v14 = vld [vmem:[%s824_s2 + $0x48] sm:$0xff]  ;;  %v625_v15 = vld [vmem:[%s824_s2] sm:$0xff]  ;;  %v630_v16 = vld [vmem:[%s824_s2 + $0x50] sm:$0xff]  ;;  %94 = vmatprep.mubr.f32.mxu0 %v615_v13 }
   0x6   :  { %v293_v17 = vpack.c.bf16 %v610_v12, %v625_v15  ;;  %v637_v18 = vld [vmem:[%s824_s2 + $0x40] sm:$0xff]  ;;  %179 = vmatprep.mubr.f32.mxu1 %v620_v14 }
   0x7   :  { %57 = vmatpush1.xpose.msra.mxu0 %v584_v6  ;;  %v297_v19 = vpack.c.bf16 %v630_v16, %v637_v18 }
   0x8   :  { %142 = vmatpush1.xpose.msra.mxu1 %v589_v7  ;;  %58 = vmatprep.subr.mxu0 %v600_v10 }
   0x9   :  { %143 = vmatprep.subr.mxu1 %v605_v11 }
   0xb   :  { %59 = vmatpush1.xpose.msra.mxu0 %v610_v12 }
   0xc   :  { %144 = vmatpush1.xpose.msra.mxu1 %v630_v16  ;;  %60 = vmatprep.subr.mxu0 %v615_v13 }
   0xd   :  { %145 = vmatprep.subr.mxu1 %v620_v14 }
   0xf   :  { %61 = vmatpush1.xpose.msra.mxu0 %v625_v15 }
  0x10   :  { %146 = vmatpush1.xpose.msra.mxu1 %v637_v18 }
  0x12   :  { %95 = vmatmul.mubr.f32.vlgmr.msra.gmra.mxu0 %v625_v15 }
  0x13   :  { %180 = vmatmul.mubr.f32.vlgmr.msra.gmra.mxu1 %v637_v18  ;;  %99 = vmatprep.mubr.f32.mxu0 %v600_v10 }
  0x14   :  { %184 = vmatprep.mubr.f32.mxu1 %v605_v11 }
  0x16   :  { %100 = vmatmul.mubr.f32.gmra.mxu0 %v610_v12 }
  0x17   :  { %185 = vmatmul.mubr.f32.gmra.mxu1 %v630_v16  ;;  %104 = vmatprep.mubr.f32.mxu0 %v572_v4 }
  0x18   :  { %189 = vmatprep.mubr.f32.mxu1 %v577_v5 }
  0x1a   :  { %105 = vmatmul.mubr.f32.gmra.mxu0 %v584_v6 }
  0x1b   :  { %190 = vmatmul.mubr.f32.gmra.mxu1 %v589_v7  ;;  %109 = vmatprep.mubr.f32.mxu0 %v550_v0 }
  0x1c   :  { %194 = vmatprep.mubr.f32.mxu1 %v555_v1 }
  0x1e   :  { %110 = vmatmul.mubr.f32.gmra.mxu0 %v560_v2  ;;  %v526_v2 = vmov 0  }
  0x1f   :  { %195 = vmatmul.mubr.f32.gmra.mxu1 %v567_v3  ;;  %339 = vmatprep.mubr.bf16.mxu0 %v526_v2 }
  0x20   :  { %398 = vmatprep.mubr.bf16.mxu1 %v526_v2 }
  0xd2   :  { %v96_v20 = vpop.f32.mrf.mxu0 }
  0xd3   :  { %v181_v21 = vpop.f32.mrf.mxu1  ;;  %v201_v23 = vsel %vm200_vm0, %v96_v20, inf }
  0xd4   :  { %v213_v22 = vsel %vm200_vm0, %v181_v21, inf  ;;  %202 = vmin.xlane.f32.xlu0 %v201_v23  ;;  %v98_v25 = vpop.f32.mrf.mxu0 }
  0xd5   :  { %214 = vmin.xlane.f32.xlu1 %v213_v22  ;;  %v183_v24 = vpop.f32.mrf.mxu1 }
  0xd6   :  { %v101_v26 = vpop.f32.mrf.mxu0 }
  0xd7   :  { %v186_v27 = vpop.f32.mrf.mxu1  ;;  %v204_v29 = vsel %vm200_vm0, %v101_v26, inf }
  0xd8   :  { %v216_v28 = vsel %vm200_vm0, %v186_v27, inf  ;;  %205 = vmin.xlane.f32.xlu0 %v204_v29  ;;  %v103_v30 = vpop.f32.mrf.mxu0 }
  0xd9   :  { %217 = vmin.xlane.f32.xlu1 %v216_v28  ;;  %v188_v31 = vpop.f32.mrf.mxu1 }
  0xda   :  { %v106_v32 = vpop.f32.mrf.mxu0 }
  0xdb   :  { %v191_v33 = vpop.f32.mrf.mxu1  ;;  %v207_v34 = vsel %vm200_vm0, %v106_v32, inf }
  0xdc   :  { %208 = vmin.xlane.f32.xlu0 %v207_v34  ;;  %v108_v35 = vpop.f32.mrf.mxu0  ;;  %v219_v37 = vsel %vm200_vm0, %v191_v33, inf }
  0xdd   :  { %v193_v36 = vpop.f32.mrf.mxu1 }
  0xde   :  { %v111_v38 = vpop.f32.mrf.mxu0 }
  0xdf   :  { %v196_v39 = vpop.f32.mrf.mxu1  ;;  %v210_v40 = vsel %vm200_vm0, %v111_v38, inf }
  0xe0   :  { %220 = vmin.xlane.f32.xlu0 %v219_v37  ;;  %211 = vmin.xlane.f32.xlu1 %v210_v40  ;;  %v113_v41 = vpop.f32.mrf.mxu0  ;;  %v222_v43 = vsel %vm200_vm0, %v196_v39, inf  ;;  %v296_v40 = vpack.c.bf16 %v550_v0, %v572_v4  ;;  %v298_v0 = vpack.c.bf16 %v605_v11, %v620_v14 }
  0xe1   :  { %v198_v42 = vpop.f32.mrf.mxu1  ;;  %v300_v41 = vpack.c.bf16 %v555_v1, %v577_v5 }
  0xe2   :  { %319 = vmatprep.subr.bf16.mxu0 %v296_v40  ;;  %v294_v42 = vpack.c.bf16 %v600_v10, %v615_v13 }
  0xe3   :  { %320 = vmatpush1.bf16.msra.mxu0 %v295_v8  ;;  %378 = vmatprep.subr.bf16.mxu1 %v300_v41 }
  0xe4   :  { %223 = vmin.xlane.f32.xlu1 %v222_v43  ;;  %321 = vmatprep.subr.bf16.mxu0 %v294_v42 }
  0xe5   :  { %379 = vmatpush1.bf16.msra.mxu1 %v299_v9 }
  0xe6   :  { %380 = vmatprep.subr.bf16.mxu1 %v298_v0 }
  0xe7   :  { %322 = vmatpush1.bf16.msra.mxu0 %v293_v17 }
  0xe9   :  { %381 = vmatpush1.bf16.msra.mxu1 %v297_v19 }
 0x15d   :  { %v203_v45 = vpop.xlane.xlu0 %202 }
 0x15e   :  { %v215_v44 = vpop.xlane.xlu1 %214  ;;  %v225_v47 = vsub.f32 %v203_v45, %v96_v20 }
 0x15f   :  { %v229_v46 = vsub.f32 %v215_v44, %v181_v21 }
 0x160   :  { %v233_v48 = vmul.f32 1.442695, %v225_v47 }
 0x161   :  { %v241_v49 = vmul.f32 1.442695, %v229_v46  ;;  %v206_v51 = vpop.xlane.xlu0 %205 }
 0x162   :  { %v218_v50 = vpop.xlane.xlu1 %217  ;;  %v226_v53 = vsub.f32 %v206_v51, %v101_v26  ;;  %494 = vpow2.f32 %v233_v48 }
 0x163   :  { %v230_v52 = vsub.f32 %v218_v50, %v186_v27  ;;  %496 = vpow2.f32 %v241_v49 }
 0x164   :  { %v235_v54 = vmul.f32 1.442695, %v226_v53  ;;  %v710_v53 = vstv %s825_s0 }
 0x165   :  { %v243_v55 = vmul.f32 1.442695, %v230_v52  ;;  %v209_v56 = vpop.xlane.xlu0 %208 }
 0x166   :  { %v227_v57 = vsub.f32 %v209_v56, %v106_v32  ;;  %498 = vpow2.f32 %v235_v54 }
 0x167   :  { %500 = vpow2.f32 %v243_v55  ;;  %v419_v55 = vld [vmem:[%s826_s1] sm:$0xff] }
 0x168   :  { %v237_v58 = vmul.f32 1.442695, %v227_v57 }
 0x169   :  { %v221_v59 = vpop.xlane.xlu0 %220  ;;  %v212_v60 = vpop.xlane.xlu1 %211 }
 0x16a   :  { %502 = vpow2.f32 %v237_v58  ;;  %v231_v61 = vsub.f32 %v221_v59, %v191_v33  ;;  %v228_v62 = vsub.f32 %v212_v60, %v111_v38  ;;  %v420_v58 = vld [vmem:[%s826_s1 + $0x8] sm:$0xff] }
 0x16c   :  { %v245_v63 = vmul.f32 1.442695, %v231_v61  ;;  %v239_v20 = vmul.f32 1.442695, %v228_v62  ;;  %v421_v62 = vld [vmem:[%s826_s1 + $0x10] sm:$0xff] }
 0x16d   :  { %v224_v21 = vpop.xlane.xlu1 %223 }
 0x16e   :  { %504 = vpow2.f32 %v245_v63  ;;  %v232_v22 = vsub.f32 %v224_v21, %v196_v39 }
 0x16f   :  { %506 = vpow2.f32 %v239_v20  ;;  %v495_v23 = vpop.eup %494  ;;  %v427_v20 = vld [vmem:[%s826_s1 + $0x40] sm:$0xff] }
 0x170   :  { %v247_v24 = vmul.f32 1.442695, %v232_v22  ;;  %v249_v25 = vsel %vm200_vm0, %v495_v23, 0.0  ;;  %v497_v26 = vpop.eup %496 }
 0x171   :  { %250 = vadd.xlane.f32.xlu0 %v249_v25  ;;  %v261_v28 = vsel %vm200_vm0, %v497_v26, 0.0 }
 0x172   :  { %508 = vpow2.f32 %v247_v24 }
 0x173   :  { %v499_v27 = vpop.eup %498 }
 0x174   :  { %v252_v29 = vsel %vm200_vm0, %v499_v27, 0.0  ;;  %v501_v30 = vpop.eup %500 }
 0x175   :  { %262 = vadd.xlane.f32.xlu0 %v261_v28  ;;  %253 = vadd.xlane.f32.xlu1 %v252_v29  ;;  %v264_v33 = vsel %vm200_vm0, %v501_v30, 0.0 }
 0x177   :  { %v503_v31 = vpop.eup %502 }
 0x178   :  { %v255_v32 = vsel %vm200_vm0, %v503_v31, 0.0 }
 0x179   :  { %256 = vadd.xlane.f32.xlu0 %v255_v32  ;;  %265 = vadd.xlane.f32.xlu1 %v264_v33 }
 0x17b   :  { %v505_v34 = vpop.eup %504 }
 0x17c   :  { %v507_v35 = vpop.eup %506  ;;  %v267_v36 = vsel %vm200_vm0, %v505_v34, 0.0 }
 0x17d   :  { %v258_v37 = vsel %vm200_vm0, %v507_v35, 0.0  ;;  %268 = vadd.xlane.f32.xlu0 %v267_v36 }
 0x17e   :  { %259 = vadd.xlane.f32.xlu1 %v258_v37 }
 0x17f   :  { %v509_v38 = vpop.eup %508 }
 0x180   :  { %v270_v39 = vsel %vm200_vm0, %v509_v38, 0.0 }
 0x182   :  { %271 = vadd.xlane.f32.xlu1 %v270_v39 }
 0x1fa   :  { %v251_v1 = vpop.xlane.xlu0 %250 }
 0x1fb   :  { %510 = vrcp.f32 %v251_v1 }
 0x1fe   :  { %v263_v4 = vpop.xlane.xlu0 %262  ;;  %v254_v3 = vpop.xlane.xlu1 %253 }
 0x1ff   :  { %512 = vrcp.f32 %v254_v3 }
 0x200   :  { %514 = vrcp.f32 %v263_v4 }
 0x202   :  { %v257_v5 = vpop.xlane.xlu0 %256  ;;  %v266_v6 = vpop.xlane.xlu1 %265 }
 0x203   :  { %516 = vrcp.f32 %v266_v6 }
 0x204   :  { %518 = vrcp.f32 %v257_v5 }
 0x206   :  { %v269_v7 = vpop.xlane.xlu0 %268 }
 0x207   :  { %v260_v8 = vpop.xlane.xlu1 %259 }
 0x208   :  { %520 = vrcp.f32 %v260_v8  ;;  %v511_v10 = vpop.eup %510 }
 0x209   :  { %522 = vrcp.f32 %v269_v7  ;;  %v281_v12 = vmul.f32 %v511_v10, %v495_v23 }
 0x20b   :  { %v272_v9 = vpop.xlane.xlu1 %271 }
 0x20c   :  { %524 = vrcp.f32 %v272_v9  ;;  %v513_v11 = vpop.eup %512 }
 0x20d   :  { %v282_v13 = vmul.f32 %v513_v11, %v499_v27  ;;  %v515_v14 = vpop.eup %514 }
 0x20e   :  { %v285_v17 = vmul.f32 %v515_v14, %v497_v26 }
 0x20f   :  { %v289_v15 = vpack.c.bf16 %v282_v13, %v281_v12 }
 0x210   :  { %v517_v16 = vpop.eup %516 }
 0x211   :  { %v286_v18 = vmul.f32 %v517_v16, %v501_v30  ;;  %489 = vmatmul.mubr.msk.bf16.vlgmr.msra.gmra.mxu0 %vm200_vm0, %v289_v15  ;;  %v519_v19 = vpop.eup %518 }
 0x212   :  { %349 = vmatprep.mubr.bf16.mxu0 %v526_v2  ;;  %v283_v46 = vmul.f32 %v519_v19, %v503_v31 }
 0x213   :  { %v291_v43 = vpack.c.bf16 %v286_v18, %v285_v17 }
 0x215   :  { %v521_v44 = vpop.eup %520  ;;  %491 = vmatmul.mubr.msk.bf16.vlgmr.msra.gmra.mxu1 %vm200_vm0, %v291_v43 }
 0x216   :  { %v523_v45 = vpop.eup %522  ;;  %v284_v47 = vmul.f32 %v521_v44, %v507_v35  ;;  %408 = vmatprep.mubr.bf16.mxu1 %v526_v2 }
 0x217   :  { %v287_v50 = vmul.f32 %v523_v45, %v505_v34 }
 0x218   :  { %v290_v49 = vpack.c.bf16 %v284_v47, %v283_v46 }
 0x219   :  { %v525_v48 = vpop.eup %524 }
 0x21a   :  { %v288_v51 = vmul.f32 %v525_v48, %v509_v38  ;;  %490 = vmatmul.mubr.msk.bf16.gmra.mxu0 %vm200_vm0, %v290_v49 }
 0x21c   :  { %v292_v52 = vpack.c.bf16 %v288_v51, %v287_v50 }
 0x21e   :  { %492 = vmatmul.mubr.msk.bf16.gmra.mxu1 %vm200_vm0, %v292_v52 }
 0x2d1   :  { %v341_v54 = vpop.f32.mrf.mxu0 }
 0x2d2   :  { %v437_v56 = vmul.f32 %v710_v53, %v341_v54 }
 0x2d3   :  { %v343_v57 = vpop.f32.mrf.mxu0 }
 0x2d4   :  { %v453_v59 = vadd.f32 %v437_v56, %v419_v55  ;;  %v438_v60 = vmul.f32 %v710_v53, %v343_v57 }
 0x2d5   :  { %v345_v61 = vpop.f32.mrf.mxu0  ;;  %v400_v63 = vpop.f32.mrf.mxu1 }
 0x2d6   :  { %469 = vst [vmem:[%s827_s3] sm:$0xff] %v453_v59  ;;  %v454_v21 = vadd.f32 %v438_v60, %v420_v58  ;;  %v439_v22 = vmul.f32 %v710_v53, %v345_v61  ;;  %v445_v23 = vmul.f32 %v710_v53, %v400_v63 }
 0x2d7   :  { %v347_v24 = vpop.f32.mrf.mxu0  ;;  %v402_v26 = vpop.f32.mrf.mxu1 }
 0x2d8   :  { %v455_v28 = vadd.f32 %v439_v22, %v421_v62  ;;  %v461_v29 = vadd.f32 %v445_v23, %v427_v20  ;;  %v440_v30 = vmul.f32 %v710_v53, %v347_v24  ;;  %v446_v31 = vmul.f32 %v710_v53, %v402_v26 }
 0x2d9   :  { %v404_v34 = vpop.f32.mrf.mxu1 }
 0x2da   :  { %v351_v32 = vpop.f32.mrf.mxu0  ;;  %v447_v39 = vmul.f32 %v710_v53, %v404_v34 }
 0x2db   :  { %v441_v38 = vmul.f32 %v710_v53, %v351_v32  ;;  %v406_v42 = vpop.f32.mrf.mxu1 }
 0x2dc   :  { %v353_v40 = vpop.f32.mrf.mxu0  ;;  %v448_v3 = vmul.f32 %v710_v53, %v406_v42 }
 0x2dd   :  { %v422_v25 = vld [vmem:[%s826_s1 + $0x18] sm:$0xff]  ;;  %v428_v27 = vld [vmem:[%s826_s1 + $0x48] sm:$0xff]  ;;  %v442_v4 = vmul.f32 %v710_v53, %v353_v40 }
 0x2de   :  { %470 = vst [vmem:[%s827_s3 + $0x8] sm:$0xff] %v454_v21  ;;  %v456_v36 = vadd.f32 %v440_v30, %v422_v25  ;;  %v462_v37 = vadd.f32 %v446_v31, %v428_v27  ;;  %v355_v5 = vpop.f32.mrf.mxu0  ;;  %v410_v7 = vpop.f32.mrf.mxu1 }
 0x2df   :  { %v443_v11 = vmul.f32 %v710_v53, %v355_v5  ;;  %v449_v12 = vmul.f32 %v710_v53, %v410_v7 }
 0x2e0   :  { %v357_v13 = vpop.f32.mrf.mxu0  ;;  %v412_v15 = vpop.f32.mrf.mxu1 }
 0x2e1   :  { %v444_v19 = vmul.f32 %v710_v53, %v357_v13  ;;  %v450_v43 = vmul.f32 %v710_v53, %v412_v15 }
 0x2e2   :  { %v414_v44 = vpop.f32.mrf.mxu1 }
 0x2e3   :  { %v451_v48 = vmul.f32 %v710_v53, %v414_v44 }
 0x2e4   :  { %v416_v49 = vpop.f32.mrf.mxu1 }
 0x2e5   :  { %v423_v33 = vld [vmem:[%s826_s1 + $0x20] sm:$0xff]  ;;  %v429_v35 = vld [vmem:[%s826_s1 + $0x50] sm:$0xff]  ;;  %v452_v52 = vmul.f32 %v710_v53, %v416_v49 }
 0x2e6   :  { %471 = vst [vmem:[%s827_s3 + $0x10] sm:$0xff] %v455_v28  ;;  %477 = vst [vmem:[%s827_s3 + $0x40] sm:$0xff] %v461_v29  ;;  %v457_v2 = vadd.f32 %v441_v38, %v423_v33  ;;  %v463_v1 = vadd.f32 %v447_v39, %v429_v35 }
 0x2ed   :  { %v424_v41 = vld [vmem:[%s826_s1 + $0x28] sm:$0xff]  ;;  %v430_v0 = vld [vmem:[%s826_s1 + $0x58] sm:$0xff] }
 0x2ee   :  { %472 = vst [vmem:[%s827_s3 + $0x18] sm:$0xff] %v456_v36  ;;  %478 = vst [vmem:[%s827_s3 + $0x48] sm:$0xff] %v462_v37  ;;  %v458_v9 = vadd.f32 %v442_v4, %v424_v41  ;;  %v464_v10 = vadd.f32 %v448_v3, %v430_v0 }
 0x2f5   :  { %v425_v6 = vld [vmem:[%s826_s1 + $0x30] sm:$0xff]  ;;  %v431_v8 = vld [vmem:[%s826_s1 + $0x60] sm:$0xff] }
 0x2f6   :  { %473 = vst [vmem:[%s827_s3 + $0x20] sm:$0xff] %v457_v2  ;;  %479 = vst [vmem:[%s827_s3 + $0x50] sm:$0xff] %v463_v1  ;;  %v459_v17 = vadd.f32 %v443_v11, %v425_v6  ;;  %v465_v18 = vadd.f32 %v449_v12, %v431_v8 }
 0x2fd   :  { %v426_v14 = vld [vmem:[%s826_s1 + $0x38] sm:$0xff]  ;;  %v432_v16 = vld [vmem:[%s826_s1 + $0x68] sm:$0xff] }
 0x2fe   :  { %474 = vst [vmem:[%s827_s3 + $0x28] sm:$0xff] %v458_v9  ;;  %480 = vst [vmem:[%s827_s3 + $0x58] sm:$0xff] %v464_v10  ;;  %v460_v46 = vadd.f32 %v444_v19, %v426_v14  ;;  %v466_v47 = vadd.f32 %v450_v43, %v432_v16 }
 0x305   :  { %v433_v45 = vld [vmem:[%s826_s1 + $0x70] sm:$0xff] }
 0x306   :  { %475 = vst [vmem:[%s827_s3 + $0x30] sm:$0xff] %v459_v17  ;;  %481 = vst [vmem:[%s827_s3 + $0x60] sm:$0xff] %v465_v18  ;;  %v467_v51 = vadd.f32 %v451_v48, %v433_v45 }
 0x30d   :  { %v434_v50 = vld [vmem:[%s826_s1 + $0x78] sm:$0xff] }
 0x30e   :  { %476 = vst [vmem:[%s827_s3 + $0x38] sm:$0xff] %v460_v46  ;;  %482 = vst [vmem:[%s827_s3 + $0x68] sm:$0xff] %v466_v47  ;;  %v468_v54 = vadd.f32 %v452_v52, %v434_v50 }
 0x30f   :  { %483 = vst [vmem:[%s827_s3 + $0x70] sm:$0xff] %v467_v51 }
 0x310   :  { %484 = vst [vmem:[%s827_s3 + $0x78] sm:$0xff] %v468_v54 }

</bundles_post_ra>
